<compile_context>
chip_gen: v6e
topology: v6e:2x2x1
jax: 0.10.0
libtpu: 0.0.40
codegen_flags: <defaults>
</compile_context>

<pallas_src>
import functools
import math

import jax
import jax.numpy as jnp
import numpy as np
from jax.experimental import pallas as pl
from jax.experimental.pallas import tpu as pltpu


# ----------------------------------------------------------------- helpers --

def _round_up(x, m):
    return (x + m - 1) // m * m


def _pick_tile(total, cap):
    """Largest multiple of 128 <= cap that divides `total` (total % 128 == 0)."""
    t = max(128, min(cap, total) // 128 * 128)
    while total % t:
        t -= 128
    return t


def _pad_to(x, shape):
    pads = [(0, s - d) for d, s in zip(x.shape, shape)]
    if any(p for _, p in pads):
        x = jnp.pad(x, pads)
    return x


def _row_tile(m):
    """Row (M) tile: biggest multiple of 8 up to 256."""
    return min(256, _round_up(m, 8))


# ------------------------------------------------------------------ linear --

def _linear_kernel(x_ref, w_ref, b_ref, o_ref):
    acc = jnp.dot(x_ref[...], w_ref[...], preferred_element_type=jnp.float32)
    o_ref[...] = (acc + b_ref[...]).astype(o_ref.dtype)


def linear(x, w, b, *, compute_dtype, tn_cap=512):
    """y = x @ w + b with w stored pre-transposed as [d_in, d_out]."""
    *lead, d_in = x.shape
    d_out = w.shape[1]
    m = math.prod(lead)

    d_in_p = _round_up(d_in, 128)
    d_out_p = _round_up(d_out, 128)
    tm = _row_tile(m)
    m_p = _round_up(m, tm)
    tn = _pick_tile(d_out_p, tn_cap)

    x_p = _pad_to(x.reshape(m, d_in), (m_p, d_in_p)).astype(compute_dtype)
    w_p = _pad_to(w, (d_in_p, d_out_p)).astype(compute_dtype)
    b_p = _pad_to(b.reshape(1, d_out), (1, d_out_p)).astype(jnp.float32)

    out = pl.pallas_call(
        _linear_kernel,
        out_shape=jax.ShapeDtypeStruct((m_p, d_out_p), jnp.float32),
        grid_spec=pltpu.PrefetchScalarGridSpec(
            num_scalar_prefetch=0,
            grid=(pl.cdiv(m, tm), d_out_p // tn),
            in_specs=[
                pl.BlockSpec((tm, d_in_p), lambda i, j: (i, 0)),
                pl.BlockSpec((d_in_p, tn), lambda i, j: (0, j)),
                pl.BlockSpec((1, tn), lambda i, j: (0, j)),
            ],
            out_specs=pl.BlockSpec((tm, tn), lambda i, j: (i, j)),
        ),
        compiler_params=pltpu.CompilerParams(
            dimension_semantics=("parallel", "parallel")),
    )(x_p, w_p, b_p)

    return out[:m, :d_out].reshape(*lead, d_out)


# --------------------------------------------------------------- attention --

def _attention_kernel(q_ref, k_ref, v_ref, o_ref, *, scale, causal):
    q = q_ref[0]                               # (Sq, Dh) compute dtype
    k = k_ref[0]                               # (Sk, Dh)
    v = v_ref[0]                               # (Sk, Dh)
    # scores = q @ k.T / scale  (f32 MXU accumulation)
    s = jax.lax.dot_general(q, k, (((1,), (1,)), ((), ())),
                            preferred_element_type=jnp.float32) * (1.0 / scale)
    if causal:
        sq, sk = s.shape
        row = jax.lax.broadcasted_iota(jnp.int32, (sq, sk), 0)
        col = jax.lax.broadcasted_iota(jnp.int32, (sq, sk), 1)
        s = jnp.where(col <= row, s, -1e30)
    m = jnp.max(s, axis=-1, keepdims=True)
    e = jnp.exp(s - m)
    p = e / jnp.sum(e, axis=-1, keepdims=True)
    # TODO(synk): attention dropout is eval-mode identity; training would mask
    # p here via pltpu.prng_seed + pltpu.stateful_bernoulli.
    o = jnp.dot(p.astype(v.dtype), v, preferred_element_type=jnp.float32)
    o_ref[0] = o.astype(o_ref.dtype)


def multi_head_attention(q_in, k_in, v_in, p, *, n_heads, scale, causal,
                         compute_dtype):
    q = linear(q_in, p["wq"], p["bq"], compute_dtype=compute_dtype)
    k = linear(k_in, p["wk"], p["bk"], compute_dtype=compute_dtype)
    v = linear(v_in, p["wv"], p["bv"], compute_dtype=compute_dtype)

    bsz, sq, d = q.shape
    sk = k.shape[1]
    dh = d // n_heads
    dh_p = _round_up(dh, 128)                  # lane-dense head dim

    def split_heads(t):
        b_, s_, _ = t.shape
        t = t.reshape(b_, s_, n_heads, dh).transpose(0, 2, 1, 3)
        t = t.reshape(b_ * n_heads, s_, dh)
        return _pad_to(t, (b_ * n_heads, s_, dh_p)).astype(compute_dtype)

    qh, kh, vh = split_heads(q), split_heads(k), split_heads(v)
    bh = bsz * n_heads

    out = pl.pallas_call(
        functools.partial(_attention_kernel, scale=scale, causal=causal),
        out_shape=jax.ShapeDtypeStruct((bh, sq, dh_p), jnp.float32),
        grid_spec=pltpu.PrefetchScalarGridSpec(
            num_scalar_prefetch=0,
            grid=(bh,),
            in_specs=[
                pl.BlockSpec((1, sq, dh_p), lambda i: (i, 0, 0)),
                pl.BlockSpec((1, sk, dh_p), lambda i: (i, 0, 0)),
                pl.BlockSpec((1, sk, dh_p), lambda i: (i, 0, 0)),
            ],
            out_specs=pl.BlockSpec((1, sq, dh_p), lambda i: (i, 0, 0)),
        ),
        compiler_params=pltpu.CompilerParams(
            dimension_semantics=("parallel",)),
    )(qh, kh, vh)

    out = out[:, :, :dh].reshape(bsz, n_heads, sq, dh)
    out = out.transpose(0, 2, 1, 3).reshape(bsz, sq, d)
    return linear(out, p["wo"], p["bo"], compute_dtype=compute_dtype)


# --------------------------------------------------- residual + LayerNorm ---

def _residual_layernorm_kernel(res_ref, y_ref, g_ref, b_ref, o_ref, *, eps):
    y = y_ref[...]
    d = y.shape[-1]
    mean = jnp.mean(y, axis=-1, keepdims=True)
    centered = y - mean
    var = jnp.sum(centered * centered, axis=-1, keepdims=True) / (d - 1)
    std = jnp.sqrt(var)                        # unbiased std (matches torch .std())
    normed = g_ref[...] * centered / (std + eps) + b_ref[...]
    o_ref[...] = (res_ref[...] + normed).astype(o_ref.dtype)


def residual_layernorm(residual, y, gamma, beta, *, eps=1e-6):
    bsz, s, d = y.shape
    m = bsz * s
    tm = _row_tile(m)
    m_p = _round_up(m, tm)

    res_p = _pad_to(residual.reshape(m, d), (m_p, d)).astype(jnp.float32)
    y_p = _pad_to(y.reshape(m, d), (m_p, d)).astype(jnp.float32)
    g = gamma.reshape(1, d).astype(jnp.float32)
    b = beta.reshape(1, d).astype(jnp.float32)

    out = pl.pallas_call(
        functools.partial(_residual_layernorm_kernel, eps=eps),
        out_shape=jax.ShapeDtypeStruct((m_p, d), jnp.float32),
        grid_spec=pltpu.PrefetchScalarGridSpec(
            num_scalar_prefetch=0,
            grid=(pl.cdiv(m, tm),),
            in_specs=[
                pl.BlockSpec((tm, d), lambda i: (i, 0)),
                pl.BlockSpec((tm, d), lambda i: (i, 0)),
                pl.BlockSpec((1, d), lambda i: (0, 0)),
                pl.BlockSpec((1, d), lambda i: (0, 0)),
            ],
            out_specs=pl.BlockSpec((tm, d), lambda i: (i, 0)),
        ),
        compiler_params=pltpu.CompilerParams(
            dimension_semantics=("parallel",)),
    )(res_p, y_p, g, b)

    # TODO(synk): residual-block dropout is eval-mode identity.
    return out[:m].reshape(bsz, s, d)


# ------------------------------------------------------------ feed-forward --

def _ffn_kernel(x_ref, w1_ref, b1_ref, w2_ref, b2_ref, o_ref, acc_ref):
    k = pl.program_id(1)

    @pl.when(k == 0)
    def _():
        acc_ref[...] = jnp.zeros_like(acc_ref)

    # h_k = relu(x @ W1[:, k_tile] + b1[k_tile]): matmuls in bf16 with f32 MXU
    # accumulation; bias add + ReLU in f32 on the VPU, before the downcast.
    h = jnp.dot(x_ref[...], w1_ref[...], preferred_element_type=jnp.float32)
    h = jnp.maximum(h + b1_ref[...], 0.0)
    # TODO(synk): FFN dropout is eval-mode identity (train mode would mask h
    # here with pltpu.prng_seed + pltpu.stateful_bernoulli).
    acc_ref[...] += jnp.dot(h.astype(w2_ref.dtype), w2_ref[...],
                            preferred_element_type=jnp.float32)

    @pl.when(k == pl.num_programs(1) - 1)
    def _():
        o_ref[...] = (acc_ref[...] + b2_ref[...]).astype(o_ref.dtype)


def feed_forward(x, w1, b1, w2, b2, *, compute_dtype, tm_cap=256, tk_cap=512):
    """relu(x @ w1 + b1) @ w2 + b2 with weights pre-transposed ([d_in, d_out])."""
    bsz, s, d_model = x.shape
    d_hidden = w1.shape[1]
    m = bsz * s

    d_p = _round_up(d_model, 128)              # lane-dense output columns
    h_p = _round_up(d_hidden, 128)
    tm = min(tm_cap, _round_up(m, 8))
    m_p = _round_up(m, tm)
    tk = _pick_tile(h_p, tk_cap)               # hidden-dim (reduction) tile

    x_p = _pad_to(x.reshape(m, d_model), (m_p, d_p)).astype(compute_dtype)
    w1_p = _pad_to(w1, (d_p, h_p)).astype(compute_dtype)
    b1_p = _pad_to(b1.reshape(1, d_hidden), (1, h_p)).astype(jnp.float32)
    w2_p = _pad_to(w2, (h_p, d_p)).astype(compute_dtype)
    b2_p = _pad_to(b2.reshape(1, d_model), (1, d_p)).astype(jnp.float32)

    cd_bytes = np.dtype(compute_dtype).itemsize
    cost = pl.CostEstimate(
        flops=4 * m_p * d_p * h_p,
        transcendentals=0,
        bytes_accessed=(m_p * d_p * cd_bytes          # x
                        + d_p * h_p * cd_bytes        # w1
                        + h_p * d_p * cd_bytes        # w2
                        + m_p * d_p * 4))             # out (f32)

    out = pl.pallas_call(
        _ffn_kernel,
        out_shape=jax.ShapeDtypeStruct((m_p, d_p), jnp.float32),
        grid_spec=pltpu.PrefetchScalarGridSpec(
            num_scalar_prefetch=0,
            grid=(pl.cdiv(m, tm), h_p // tk),          # (M tiles, hidden tiles)
            in_specs=[
                pl.BlockSpec((tm, d_p), lambda i, k: (i, 0)),
                pl.BlockSpec((d_p, tk), lambda i, k: (0, k)),
                pl.BlockSpec((1, tk), lambda i, k: (0, k)),
                pl.BlockSpec((tk, d_p), lambda i, k: (k, 0)),
                # b2's index map is constant; on v7x it could be single-buffered
                # (pipeline_mode=pl.Buffered(1)) to save VMEM.
                pl.BlockSpec((1, d_p), lambda i, k: (0, 0)),
            ],
            out_specs=pl.BlockSpec((tm, d_p), lambda i, k: (i, 0)),
            scratch_shapes=[pltpu.VMEM((tm, d_p), jnp.float32)],
        ),
        compiler_params=pltpu.CompilerParams(
            dimension_semantics=("parallel", "arbitrary")),
        cost_estimate=cost,
    )(x_p, w1_p, b1_p, w2_p, b2_p)

    return out[:m, :d_model].reshape(bsz, s, d_model)


# ----------------------------------------------------------- decoder layer --

def _decoder_layer_impl(x, encoding, params, *, n_heads, compute_dtype):
    d_model = x.shape[-1]
    scale = math.sqrt(d_model)   # spec: Attention(d_key=args.d_model) -> sqrt(d_model)
    eps = 1e-6

    # self-attention residual block (causal)
    a = multi_head_attention(x, x, x, params["selfattn"], n_heads=n_heads,
                             scale=scale, causal=True, compute_dtype=compute_dtype)
    x = residual_layernorm(x, a, params["norm1"]["gamma"], params["norm1"]["beta"], eps=eps)

    # encoder/decoder cross-attention residual block
    a = multi_head_attention(x, encoding, encoding, params["crossattn"], n_heads=n_heads,
                             scale=scale, causal=False, compute_dtype=compute_dtype)
    x = residual_layernorm(x, a, params["norm2"]["gamma"], params["norm2"]["beta"], eps=eps)

    # feed-forward residual block
    f = feed_forward(x, params["ffn"]["w1"], params["ffn"]["b1"],
                     params["ffn"]["w2"], params["ffn"]["b2"],
                     compute_dtype=compute_dtype)
    x = residual_layernorm(x, f, params["norm3"]["gamma"], params["norm3"]["beta"], eps=eps)
    return x


@functools.partial(jax.jit, static_argnames=("n_heads", "compute_dtype"))
def decoder_layer(x, encoding, params, *, n_heads, compute_dtype=jnp.bfloat16):
    return _decoder_layer_impl(x, encoding, params, n_heads=n_heads,
                               compute_dtype=compute_dtype)


# -------------------------------------------------- plain-JAX reference -----

def _linear_ref(x, w, b, cd):
    return jnp.einsum("...i,io->...o", x.astype(cd), w.astype(cd),
                      preferred_element_type=jnp.float32) + b.astype(jnp.float32)


def _mha_ref(q_in, k_in, v_in, p, n_heads, scale, causal, cd):
    q = _linear_ref(q_in, p["wq"], p["bq"], cd)
    k = _linear_ref(k_in, p["wk"], p["bk"], cd)
    v = _linear_ref(v_in, p["wv"], p["bv"], cd)
    bsz, sq, d = q.shape
    sk = k.shape[1]
    dh = d // n_heads

    def split(t):
        b_, s_, _ = t.shape
        return t.reshape(b_, s_, n_heads, dh).transpose(0, 2, 1, 3).astype(cd)

    qh, kh, vh = split(q), split(k), split(v)
    s = jnp.einsum("bhqd,bhkd->bhqk", qh, kh,
                   preferred_element_type=jnp.float32) * (1.0 / scale)
    if causal:
        mask = jnp.tril(jnp.ones((sq, sk), bool))
        s = jnp.where(mask, s, -1e30)
    m = jnp.max(s, axis=-1, keepdims=True)
    e = jnp.exp(s - m)
    probs = e / jnp.sum(e, axis=-1, keepdims=True)
    o = jnp.einsum("bhqk,bhkd->bhqd", probs.astype(cd), vh,
                   preferred_element_type=jnp.float32)
    o = o.transpose(0, 2, 1, 3).reshape(bsz, sq, d)
    return _linear_ref(o, p["wo"], p["bo"], cd)


def _residual_ln_ref(residual, y, gamma, beta, eps=1e-6):
    y = y.astype(jnp.float32)
    mean = jnp.mean(y, axis=-1, keepdims=True)
    centered = y - mean
    var = jnp.sum(centered * centered, axis=-1, keepdims=True) / (y.shape[-1] - 1)
    return residual + gamma * centered / (jnp.sqrt(var) + eps) + beta


def _ffn_ref(x, w1, b1, w2, b2, cd):
    h = jnp.einsum("...i,ih->...h", x.astype(cd), w1.astype(cd),
                   preferred_element_type=jnp.float32) + b1.astype(jnp.float32)
    h = jnp.maximum(h, 0.0)
    return jnp.einsum("...h,ho->...o", h.astype(cd), w2.astype(cd),
                      preferred_element_type=jnp.float32) + b2.astype(jnp.float32)


def decoder_layer_ref(x, encoding, params, n_heads, cd):
    d_model = x.shape[-1]
    scale = math.sqrt(d_model)
    a = _mha_ref(x, x, x, params["selfattn"], n_heads, scale, True, cd)
    x = _residual_ln_ref(x, a, params["norm1"]["gamma"], params["norm1"]["beta"])
    a = _mha_ref(x, encoding, encoding, params["crossattn"], n_heads, scale, False, cd)
    x = _residual_ln_ref(x, a, params["norm2"]["gamma"], params["norm2"]["beta"])
    f = _ffn_ref(x, params["ffn"]["w1"], params["ffn"]["b1"],
                 params["ffn"]["w2"], params["ffn"]["b2"], cd)
    x = _residual_ln_ref(x, f, params["norm3"]["gamma"], params["norm3"]["beta"])
    return x


# ----------------------------------------------------------------- params ---

def init_decoder_params(key, d_model, d_hidden):
    # PyTorch nn.Linear init U(-1/sqrt(fan_in), 1/sqrt(fan_in)); weights stored
    # pre-transposed ([d_in, d_out]) once at init (perf feedback).
    def linear_init(k, d_in, d_out):
        kw, kb = jax.random.split(k)
        bound = 1.0 / math.sqrt(d_in)
        w = jax.random.uniform(kw, (d_in, d_out), jnp.float32, -bound, bound)
        b = jax.random.uniform(kb, (d_out,), jnp.float32, -bound, bound)
        return w, b

    def mha_init(k):
        ks = jax.random.split(k, 4)
        wq, bq = linear_init(ks[0], d_model, d_model)
        wk, bk = linear_init(ks[1], d_model, d_model)
        wv, bv = linear_init(ks[2], d_model, d_model)
        wo, bo = linear_init(ks[3], d_model, d_model)
        return dict(wq=wq, bq=bq, wk=wk, bk=bk, wv=wv, bv=bv, wo=wo, bo=bo)

    def ln_init():
        return dict(gamma=jnp.ones((d_model,), jnp.float32),
                    beta=jnp.zeros((d_model,), jnp.float32))

    k_self, k_cross, k_ff1, k_ff2 = jax.random.split(key, 4)
    w1, b1 = linear_init(k_ff1, d_model, d_hidden)
    w2, b2 = linear_init(k_ff2, d_hidden, d_model)
    return dict(selfattn=mha_init(k_self), crossattn=mha_init(k_cross),
                ffn=dict(w1=w1, b1=b1, w2=w2, b2=b2),
                norm1=ln_init(), norm2=ln_init(), norm3=ln_init())


if __name__ == "__main__":
    batch, seq, seq_enc, d_model, d_hidden, n_heads = 2, 8, 8, 32, 64, 4

    key = jax.random.PRNGKey(0)
    kx, ke, kp = jax.random.split(key, 3)
    x = jax.random.normal(kx, (batch, seq, d_model), jnp.float32)
    encoding = jax.random.normal(ke, (batch, seq_enc, d_model), jnp.float32)
    params = init_decoder_params(kp, d_model, d_hidden)

    out = decoder_layer(x, encoding, params, n_heads=n_heads)
    out = jax.block_until_ready(out)

    ref = decoder_layer_ref(x, encoding, params, n_heads, jnp.bfloat16)
    assert out.shape == (batch, seq, d_model)
    err = float(jnp.max(jnp.abs(out - ref)))
    assert jnp.allclose(out, ref, atol=3e-2, rtol=3e-2), f"max abs err {err}"

    print("KERNEL_OK")
</pallas_src>

<mosaic_0001>
module attributes {stable_mosaic.version = 11 : i64} {
  func.func @_linear_kernel(%arg0: i32, %arg1: i32, %arg2: memref<16x128xbf16, #tpu.memory_space<vmem>>, %arg3: memref<128x128xbf16, #tpu.memory_space<vmem>>, %arg4: memref<1x128xf32, #tpu.memory_space<vmem>>, %arg5: memref<16x128xf32, #tpu.memory_space<vmem>>) attributes {dimension_semantics = [#tpu.dimension_semantics<parallel>, #tpu.dimension_semantics<parallel>], iteration_bounds = array<i64: 1, 1>, scalar_prefetch = 0 : i64, scratch_operands = 0 : i64, tpu.core_type = #tpu.core_type<tc>, window_params = [{transform_indices = @transform_0, window_bounds = array<i64: 16, 128>}, {transform_indices = @transform_1, window_bounds = array<i64: 128, 128>}, {transform_indices = @transform_2, window_bounds = array<i64: 1, 128>}, {transform_indices = @transform_3, window_bounds = array<i64: 16, 128>}]} {
    %c0 = arith.constant 0 : index
    %c0_0 = arith.constant 0 : index
    %0 = vector.load %arg2[%c0, %c0_0] : memref<16x128xbf16, #tpu.memory_space<vmem>>, vector<16x128xbf16>
    %c0_1 = arith.constant 0 : index
    %c0_2 = arith.constant 0 : index
    %1 = vector.load %arg3[%c0_1, %c0_2] : memref<128x128xbf16, #tpu.memory_space<vmem>>, vector<128x128xbf16>
    %cst = arith.constant dense<0.000000e+00> : vector<16x128xf32>
    %2 = tpu.matmul %0, %1, %cst {dimension_numbers = #tpu.dot_dimension_numbers<[1], [0], [0], [1], [0, 0, 1, 1], [], []>} : vector<16x128xbf16>, vector<128x128xbf16>, vector<16x128xf32> -> vector<16x128xf32>
    %c0_3 = arith.constant 0 : index
    %c0_4 = arith.constant 0 : index
    %3 = vector.load %arg4[%c0_3, %c0_4] : memref<1x128xf32, #tpu.memory_space<vmem>>, vector<1x128xf32>
    %4 = vector.broadcast %3 : vector<1x128xf32> to vector<16x128xf32>
    %5 = arith.addf %2, %4 : vector<16x128xf32>
    %c0_5 = arith.constant 0 : index
    %c0_6 = arith.constant 0 : index
    %6 = vector.load %arg5[%c0_5, %c0_6] : memref<16x128xf32, #tpu.memory_space<vmem>>, vector<16x128xf32>
    tpu.vector_store %arg5[%c0_5, %c0_6], %5 {strides = array<i32>} : memref<16x128xf32, #tpu.memory_space<vmem>>, vector<16x128xf32>,
    return
  }
  func.func @transform_0(%arg0: i32, %arg1: i32) -> (i32, i32) {
    %c0_i32 = arith.constant 0 : i32
    %c0_i32_0 = arith.constant 0 : i32
    return %arg0, %c0_i32 : i32, i32
  }
  func.func @transform_1(%arg0: i32, %arg1: i32) -> (i32, i32) {
    %c0_i32 = arith.constant 0 : i32
    %c0_i32_0 = arith.constant 0 : i32
    return %c0_i32, %arg1 : i32, i32
  }
  func.func @transform_2(%arg0: i32, %arg1: i32) -> (i32, i32) {
    %c0_i32 = arith.constant 0 : i32
    %c0_i32_0 = arith.constant 0 : i32
    return %c0_i32, %arg1 : i32, i32
  }
  func.func @transform_3(%arg0: i32, %arg1: i32) -> (i32, i32) {
    %c0_i32 = arith.constant 0 : i32
    return %arg0, %arg1 : i32, i32
  }
}

module attributes {stable_mosaic.version = 11 : i64} {
  func.func @_attention_kernel(%arg0: i32, %arg1: memref<1x8x128xbf16, #tpu.memory_space<vmem>>, %arg2: memref<1x8x128xbf16, #tpu.memory_space<vmem>>, %arg3: memref<1x8x128xbf16, #tpu.memory_space<vmem>>, %arg4: memref<1x8x128xf32, #tpu.memory_space<vmem>>) attributes {dimension_semantics = [#tpu.dimension_semantics<parallel>], iteration_bounds = array<i64: 8>, scalar_prefetch = 0 : i64, scratch_operands = 0 : i64, tpu.core_type = #tpu.core_type<tc>, window_params = [{transform_indices = @transform_0, window_bounds = array<i64: 1, 8, 128>}, {transform_indices = @transform_1, window_bounds = array<i64: 1, 8, 128>}, {transform_indices = @transform_2, window_bounds = array<i64: 1, 8, 128>}, {transform_indices = @transform_3, window_bounds = array<i64: 1, 8, 128>}]} {
    %c0 = arith.constant 0 : index
    %c0_0 = arith.constant 0 : index
    %c0_1 = arith.constant 0 : index
    %0 = vector.load %arg1[%c0, %c0_0, %c0_1] : memref<1x8x128xbf16, #tpu.memory_space<vmem>>, vector<1x8x128xbf16>
    %1 = vector.shape_cast %0 : vector<1x8x128xbf16> to vector<8x128xbf16>
    %c0_2 = arith.constant 0 : index
    %c0_3 = arith.constant 0 : index
    %c0_4 = arith.constant 0 : index
    %2 = vector.load %arg2[%c0_2, %c0_3, %c0_4] : memref<1x8x128xbf16, #tpu.memory_space<vmem>>, vector<1x8x128xbf16>
    %3 = vector.shape_cast %2 : vector<1x8x128xbf16> to vector<8x128xbf16>
    %c0_5 = arith.constant 0 : index
    %c0_6 = arith.constant 0 : index
    %c0_7 = arith.constant 0 : index
    %4 = vector.load %arg3[%c0_5, %c0_6, %c0_7] : memref<1x8x128xbf16, #tpu.memory_space<vmem>>, vector<1x8x128xbf16>
    %5 = vector.shape_cast %4 : vector<1x8x128xbf16> to vector<8x128xbf16>
    %cst = arith.constant dense<0.000000e+00> : vector<8x8xf32>
    %6 = tpu.matmul %1, %3, %cst {dimension_numbers = #tpu.dot_dimension_numbers<[1], [1], [0], [0], [0, 0, 1, 0], [], []>} : vector<8x128xbf16>, vector<8x128xbf16>, vector<8x8xf32> -> vector<8x8xf32>
    %cst_8 = arith.constant 0.176776692 : f32
    %7 = vector.broadcast %cst_8 : f32 to vector<8x8xf32>
    %8 = arith.mulf %6, %7 : vector<8x8xf32>
    %9 = tpu.iota {dimensions = array<i32: 0>} : vector<8x8xi32>
    %10 = tpu.iota {dimensions = array<i32: 1>} : vector<8x8xi32>
    %11 = arith.cmpi sle, %10, %9 : vector<8x8xi32>
    %cst_9 = arith.constant -1.000000e+30 : f32
    %12 = vector.broadcast %cst_9 : f32 to vector<8x8xf32>
    %13 = arith.select %11, %8, %12 : vector<8x8xi1>, vector<8x8xf32>
    %cst_10 = arith.constant dense<0xFF800000> : vector<8xf32>
    %14 = vector.multi_reduction <maximumf>, %13, %cst_10 [1] : vector<8x8xf32> to vector<8xf32>
    %15 = vector.shape_cast %14 : vector<8xf32> to vector<8x1xf32>
    %16 = vector.broadcast %15 : vector<8x1xf32> to vector<8x8xf32>
    %17 = arith.subf %13, %16 : vector<8x8xf32>
    %18 = math.exp %17 : vector<8x8xf32>
    %cst_11 = arith.constant dense<0.000000e+00> : vector<8xf32>
    %19 = vector.multi_reduction <add>, %18, %cst_11 [1] : vector<8x8xf32> to vector<8xf32>
    %20 = vector.shape_cast %19 : vector<8xf32> to vector<8x1xf32>
    %21 = vector.broadcast %20 : vector<8x1xf32> to vector<8x8xf32>
    %22 = arith.divf %18, %21 : vector<8x8xf32>
    %23 = arith.truncf %22 : vector<8x8xf32> to vector<8x8xbf16>
    %cst_12 = arith.constant dense<0.000000e+00> : vector<8x128xf32>
    %24 = tpu.matmul %23, %5, %cst_12 {dimension_numbers = #tpu.dot_dimension_numbers<[1], [0], [0], [1], [0, 0, 1, 1], [], []>} : vector<8x8xbf16>, vector<8x128xbf16>, vector<8x128xf32> -> vector<8x128xf32>
    %c0_13 = arith.constant 0 : index
    %c0_14 = arith.constant 0 : index
    %c0_15 = arith.constant 0 : index
    %25 = vector.load %arg4[%c0_13, %c0_14, %c0_15] : memref<1x8x128xf32, #tpu.memory_space<vmem>>, vector<1x8x128xf32>
    %26 = vector.shape_cast %25 : vector<1x8x128xf32> to vector<8x128xf32>
    %27 = vector.shape_cast %24 : vector<8x128xf32> to vector<1x8x128xf32>
    tpu.vector_store %arg4[%c0_13, %c0_14, %c0_15], %27 {strides = array<i32>} : memref<1x8x128xf32, #tpu.memory_space<vmem>>, vector<1x8x128xf32>,
    return
  }
  func.func @transform_0(%arg0: i32) -> (i32, i32, i32) {
    %c0_i32 = arith.constant 0 : i32
    %c0_i32_0 = arith.constant 0 : i32
    %c0_i32_1 = arith.constant 0 : i32
    return %arg0, %c0_i32, %c0_i32_0 : i32, i32, i32
  }
  func.func @transform_1(%arg0: i32) -> (i32, i32, i32) {
    %c0_i32 = arith.constant 0 : i32
    %c0_i32_0 = arith.constant 0 : i32
    %c0_i32_1 = arith.constant 0 : i32
    return %arg0, %c0_i32, %c0_i32_0 : i32, i32, i32
  }
  func.func @transform_2(%arg0: i32) -> (i32, i32, i32) {
    %c0_i32 = arith.constant 0 : i32
    %c0_i32_0 = arith.constant 0 : i32
    %c0_i32_1 = arith.constant 0 : i32
    return %arg0, %c0_i32, %c0_i32_0 : i32, i32, i32
  }
  func.func @transform_3(%arg0: i32) -> (i32, i32, i32) {
    %c0_i32 = arith.constant 0 : i32
    %c0_i32_0 = arith.constant 0 : i32
    %c0_i32_1 = arith.constant 0 : i32
    return %arg0, %c0_i32, %c0_i32_0 : i32, i32, i32
  }
}

module attributes {stable_mosaic.version = 11 : i64} {
  func.func @_residual_layernorm_kernel(%arg0: i32, %arg1: memref<16x32xf32, #tpu.memory_space<vmem>>, %arg2: memref<16x32xf32, #tpu.memory_space<vmem>>, %arg3: memref<1x32xf32, #tpu.memory_space<vmem>>, %arg4: memref<1x32xf32, #tpu.memory_space<vmem>>, %arg5: memref<16x32xf32, #tpu.memory_space<vmem>>) attributes {dimension_semantics = [#tpu.dimension_semantics<parallel>], iteration_bounds = array<i64: 1>, scalar_prefetch = 0 : i64, scratch_operands = 0 : i64, tpu.core_type = #tpu.core_type<tc>, window_params = [{transform_indices = @transform_0, window_bounds = array<i64: 16, 32>}, {transform_indices = @transform_1, window_bounds = array<i64: 16, 32>}, {pipeline_mode = #tpu.pipeline_mode<synchronous>, transform_indices = @transform_2, window_bounds = array<i64: 1, 32>}, {pipeline_mode = #tpu.pipeline_mode<synchronous>, transform_indices = @transform_3, window_bounds = array<i64: 1, 32>}, {transform_indices = @transform_4, window_bounds = array<i64: 16, 32>}]} {
    %c0 = arith.constant 0 : index
    %c0_0 = arith.constant 0 : index
    %0 = vector.load %arg2[%c0, %c0_0] : memref<16x32xf32, #tpu.memory_space<vmem>>, vector<16x32xf32>
    %cst = arith.constant dense<0.000000e+00> : vector<16xf32>
    %1 = vector.multi_reduction <add>, %0, %cst [1] : vector<16x32xf32> to vector<16xf32>
    %2 = vector.shape_cast %1 : vector<16xf32> to vector<16x1xf32>
    %cst_1 = arith.constant 3.200000e+01 : f32
    %3 = vector.broadcast %cst_1 : f32 to vector<16x1xf32>
    %4 = arith.divf %2, %3 : vector<16x1xf32>
    %5 = vector.broadcast %4 : vector<16x1xf32> to vector<16x32xf32>
    %6 = arith.subf %0, %5 : vector<16x32xf32>
    %7 = arith.mulf %6, %6 : vector<16x32xf32>
    %cst_2 = arith.constant dense<0.000000e+00> : vector<16xf32>
    %8 = vector.multi_reduction <add>, %7, %cst_2 [1] : vector<16x32xf32> to vector<16xf32>
    %9 = vector.shape_cast %8 : vector<16xf32> to vector<16x1xf32>
    %cst_3 = arith.constant 3.100000e+01 : f32
    %10 = vector.broadcast %cst_3 : f32 to vector<16x1xf32>
    %11 = arith.divf %9, %10 : vector<16x1xf32>
    %12 = math.sqrt %11 : vector<16x1xf32>
    %c0_4 = arith.constant 0 : index
    %c0_5 = arith.constant 0 : index
    %13 = vector.load %arg3[%c0_4, %c0_5] : memref<1x32xf32, #tpu.memory_space<vmem>>, vector<1x32xf32>
    %14 = vector.broadcast %13 : vector<1x32xf32> to vector<16x32xf32>
    %15 = arith.mulf %14, %6 : vector<16x32xf32>
    %cst_6 = arith.constant 9.99999997E-7 : f32
    %16 = vector.broadcast %cst_6 : f32 to vector<16x1xf32>
    %17 = arith.addf %12, %16 : vector<16x1xf32>
    %18 = vector.broadcast %17 : vector<16x1xf32> to vector<16x32xf32>
    %19 = arith.divf %15, %18 : vector<16x32xf32>
    %c0_7 = arith.constant 0 : index
    %c0_8 = arith.constant 0 : index
    %20 = vector.load %arg4[%c0_7, %c0_8] : memref<1x32xf32, #tpu.memory_space<vmem>>, vector<1x32xf32>
    %21 = vector.broadcast %20 : vector<1x32xf32> to vector<16x32xf32>
    %22 = arith.addf %19, %21 : vector<16x32xf32>
    %c0_9 = arith.constant 0 : index
    %c0_10 = arith.constant 0 : index
    %23 = vector.load %arg1[%c0_9, %c0_10] : memref<16x32xf32, #tpu.memory_space<vmem>>, vector<16x32xf32>
    %24 = arith.addf %23, %22 : vector<16x32xf32>
    %c0_11 = arith.constant 0 : index
    %c0_12 = arith.constant 0 : index
    %25 = vector.load %arg5[%c0_11, %c0_12] : memref<16x32xf32, #tpu.memory_space<vmem>>, vector<16x32xf32>
    tpu.vector_store %arg5[%c0_11, %c0_12], %24 {strides = array<i32>} : memref<16x32xf32, #tpu.memory_space<vmem>>, vector<16x32xf32>,
    return
  }
  func.func @transform_0(%arg0: i32) -> (i32, i32) {
    %c0_i32 = arith.constant 0 : i32
    %c0_i32_0 = arith.constant 0 : i32
    return %arg0, %c0_i32 : i32, i32
  }
  func.func @transform_1(%arg0: i32) -> (i32, i32) {
    %c0_i32 = arith.constant 0 : i32
    %c0_i32_0 = arith.constant 0 : i32
    return %arg0, %c0_i32 : i32, i32
  }
  func.func @transform_2(%arg0: i32) -> (i32, i32) {
    %c0_i32 = arith.constant 0 : i32
    %c0_i32_0 = arith.constant 0 : i32
    %c0_i32_1 = arith.constant 0 : i32
    return %c0_i32, %c0_i32_0 : i32, i32
  }
  func.func @transform_3(%arg0: i32) -> (i32, i32) {
    %c0_i32 = arith.constant 0 : i32
    %c0_i32_0 = arith.constant 0 : i32
    %c0_i32_1 = arith.constant 0 : i32
    return %c0_i32, %c0_i32_0 : i32, i32
  }
  func.func @transform_4(%arg0: i32) -> (i32, i32) {
    %c0_i32 = arith.constant 0 : i32
    %c0_i32_0 = arith.constant 0 : i32
    return %arg0, %c0_i32 : i32, i32
  }
}

module attributes {stable_mosaic.version = 11 : i64} {
  func.func @_attention_kernel(%arg0: i32, %arg1: memref<1x8x128xbf16, #tpu.memory_space<vmem>>, %arg2: memref<1x8x128xbf16, #tpu.memory_space<vmem>>, %arg3: memref<1x8x128xbf16, #tpu.memory_space<vmem>>, %arg4: memref<1x8x128xf32, #tpu.memory_space<vmem>>) attributes {dimension_semantics = [#tpu.dimension_semantics<parallel>], iteration_bounds = array<i64: 8>, scalar_prefetch = 0 : i64, scratch_operands = 0 : i64, tpu.core_type = #tpu.core_type<tc>, window_params = [{transform_indices = @transform_0, window_bounds = array<i64: 1, 8, 128>}, {transform_indices = @transform_1, window_bounds = array<i64: 1, 8, 128>}, {transform_indices = @transform_2, window_bounds = array<i64: 1, 8, 128>}, {transform_indices = @transform_3, window_bounds = array<i64: 1, 8, 128>}]} {
    %c0 = arith.constant 0 : index
    %c0_0 = arith.constant 0 : index
    %c0_1 = arith.constant 0 : index
    %0 = vector.load %arg1[%c0, %c0_0, %c0_1] : memref<1x8x128xbf16, #tpu.memory_space<vmem>>, vector<1x8x128xbf16>
    %1 = vector.shape_cast %0 : vector<1x8x128xbf16> to vector<8x128xbf16>
    %c0_2 = arith.constant 0 : index
    %c0_3 = arith.constant 0 : index
    %c0_4 = arith.constant 0 : index
    %2 = vector.load %arg2[%c0_2, %c0_3, %c0_4] : memref<1x8x128xbf16, #tpu.memory_space<vmem>>, vector<1x8x128xbf16>
    %3 = vector.shape_cast %2 : vector<1x8x128xbf16> to vector<8x128xbf16>
    %c0_5 = arith.constant 0 : index
    %c0_6 = arith.constant 0 : index
    %c0_7 = arith.constant 0 : index
    %4 = vector.load %arg3[%c0_5, %c0_6, %c0_7] : memref<1x8x128xbf16, #tpu.memory_space<vmem>>, vector<1x8x128xbf16>
    %5 = vector.shape_cast %4 : vector<1x8x128xbf16> to vector<8x128xbf16>
    %cst = arith.constant dense<0.000000e+00> : vector<8x8xf32>
    %6 = tpu.matmul %1, %3, %cst {dimension_numbers = #tpu.dot_dimension_numbers<[1], [1], [0], [0], [0, 0, 1, 0], [], []>} : vector<8x128xbf16>, vector<8x128xbf16>, vector<8x8xf32> -> vector<8x8xf32>
    %cst_8 = arith.constant 0.176776692 : f32
    %7 = vector.broadcast %cst_8 : f32 to vector<8x8xf32>
    %8 = arith.mulf %6, %7 : vector<8x8xf32>
    %cst_9 = arith.constant dense<0xFF800000> : vector<8xf32>
    %9 = vector.multi_reduction <maximumf>, %8, %cst_9 [1] : vector<8x8xf32> to vector<8xf32>
    %10 = vector.shape_cast %9 : vector<8xf32> to vector<8x1xf32>
    %11 = vector.broadcast %10 : vector<8x1xf32> to vector<8x8xf32>
    %12 = arith.subf %8, %11 : vector<8x8xf32>
    %13 = math.exp %12 : vector<8x8xf32>
    %cst_10 = arith.constant dense<0.000000e+00> : vector<8xf32>
    %14 = vector.multi_reduction <add>, %13, %cst_10 [1] : vector<8x8xf32> to vector<8xf32>
    %15 = vector.shape_cast %14 : vector<8xf32> to vector<8x1xf32>
    %16 = vector.broadcast %15 : vector<8x1xf32> to vector<8x8xf32>
    %17 = arith.divf %13, %16 : vector<8x8xf32>
    %18 = arith.truncf %17 : vector<8x8xf32> to vector<8x8xbf16>
    %cst_11 = arith.constant dense<0.000000e+00> : vector<8x128xf32>
    %19 = tpu.matmul %18, %5, %cst_11 {dimension_numbers = #tpu.dot_dimension_numbers<[1], [0], [0], [1], [0, 0, 1, 1], [], []>} : vector<8x8xbf16>, vector<8x128xbf16>, vector<8x128xf32> -> vector<8x128xf32>
    %c0_12 = arith.constant 0 : index
    %c0_13 = arith.constant 0 : index
    %c0_14 = arith.constant 0 : index
    %20 = vector.load %arg4[%c0_12, %c0_13, %c0_14] : memref<1x8x128xf32, #tpu.memory_space<vmem>>, vector<1x8x128xf32>
    %21 = vector.shape_cast %20 : vector<1x8x128xf32> to vector<8x128xf32>
    %22 = vector.shape_cast %19 : vector<8x128xf32> to vector<1x8x128xf32>
    tpu.vector_store %arg4[%c0_12, %c0_13, %c0_14], %22 {strides = array<i32>} : memref<1x8x128xf32, #tpu.memory_space<vmem>>, vector<1x8x128xf32>,
    return
  }
  func.func @transform_0(%arg0: i32) -> (i32, i32, i32) {
    %c0_i32 = arith.constant 0 : i32
    %c0_i32_0 = arith.constant 0 : i32
    %c0_i32_1 = arith.constant 0 : i32
    return %arg0, %c0_i32, %c0_i32_0 : i32, i32, i32
  }
  func.func @transform_1(%arg0: i32) -> (i32, i32, i32) {
    %c0_i32 = arith.constant 0 : i32
    %c0_i32_0 = arith.constant 0 : i32
    %c0_i32_1 = arith.constant 0 : i32
    return %arg0, %c0_i32, %c0_i32_0 : i32, i32, i32
  }
  func.func @transform_2(%arg0: i32) -> (i32, i32, i32) {
    %c0_i32 = arith.constant 0 : i32
    %c0_i32_0 = arith.constant 0 : i32
    %c0_i32_1 = arith.constant 0 : i32
    return %arg0, %c0_i32, %c0_i32_0 : i32, i32, i32
  }
  func.func @transform_3(%arg0: i32) -> (i32, i32, i32) {
    %c0_i32 = arith.constant 0 : i32
    %c0_i32_0 = arith.constant 0 : i32
    %c0_i32_1 = arith.constant 0 : i32
    return %arg0, %c0_i32, %c0_i32_0 : i32, i32, i32
  }
}

module attributes {stable_mosaic.version = 11 : i64} {
  func.func @_ffn_kernel(%arg0: i32, %arg1: i32, %arg2: memref<16x128xbf16, #tpu.memory_space<vmem>>, %arg3: memref<128x128xbf16, #tpu.memory_space<vmem>>, %arg4: memref<1x128xf32, #tpu.memory_space<vmem>>, %arg5: memref<128x128xbf16, #tpu.memory_space<vmem>>, %arg6: memref<1x128xf32, #tpu.memory_space<vmem>>, %arg7: memref<16x128xf32, #tpu.memory_space<vmem>>, %arg8: memref<16x128xf32, #tpu.memory_space<vmem>>) attributes {dimension_semantics = [#tpu.dimension_semantics<parallel>, #tpu.dimension_semantics<arbitrary>], iteration_bounds = array<i64: 1, 1>, scalar_prefetch = 0 : i64, scratch_operands = 1 : i64, tpu.core_type = #tpu.core_type<tc>, window_params = [{transform_indices = @transform_0, window_bounds = array<i64: 16, 128>}, {transform_indices = @transform_1, window_bounds = array<i64: 128, 128>}, {transform_indices = @transform_2, window_bounds = array<i64: 1, 128>}, {transform_indices = @transform_3, window_bounds = array<i64: 128, 128>}, {pipeline_mode = #tpu.pipeline_mode<synchronous>, transform_indices = @transform_4, window_bounds = array<i64: 1, 128>}, {transform_indices = @transform_5, window_bounds = array<i64: 16, 128>}]} {
    %c0_i32 = arith.constant 0 : i32
    %0 = arith.cmpi eq, %arg1, %c0_i32 : i32
    %1 = arith.extui %0 : i1 to i32
    %c0_i32_0 = arith.constant 0 : i32
    %2 = arith.cmpi ne, %1, %c0_i32_0 : i32
    scf.if %2 {
      %cst_16 = arith.constant 0.000000e+00 : f32
      %20 = vector.broadcast %cst_16 : f32 to vector<16x128xf32>
      %c0_17 = arith.constant 0 : index
      %c0_18 = arith.constant 0 : index
      %21 = vector.load %arg8[%c0_17, %c0_18] : memref<16x128xf32, #tpu.memory_space<vmem>>, vector<16x128xf32>
      tpu.vector_store %arg8[%c0_17, %c0_18], %20 {strides = array<i32>} : memref<16x128xf32, #tpu.memory_space<vmem>>, vector<16x128xf32>,
    } else {
    }
    %c0 = arith.constant 0 : index
    %c0_1 = arith.constant 0 : index
    %3 = vector.load %arg2[%c0, %c0_1] : memref<16x128xbf16, #tpu.memory_space<vmem>>, vector<16x128xbf16>
    %c0_2 = arith.constant 0 : index
    %c0_3 = arith.constant 0 : index
    %4 = vector.load %arg3[%c0_2, %c0_3] : memref<128x128xbf16, #tpu.memory_space<vmem>>, vector<128x128xbf16>
    %cst = arith.constant dense<0.000000e+00> : vector<16x128xf32>
    %5 = tpu.matmul %3, %4, %cst {dimension_numbers = #tpu.dot_dimension_numbers<[1], [0], [0], [1], [0, 0, 1, 1], [], []>} : vector<16x128xbf16>, vector<128x128xbf16>, vector<16x128xf32> -> vector<16x128xf32>
    %c0_4 = arith.constant 0 : index
    %c0_5 = arith.constant 0 : index
    %6 = vector.load %arg4[%c0_4, %c0_5] : memref<1x128xf32, #tpu.memory_space<vmem>>, vector<1x128xf32>
    %7 = vector.broadcast %6 : vector<1x128xf32> to vector<16x128xf32>
    %8 = arith.addf %5, %7 : vector<16x128xf32>
    %cst_6 = arith.constant 0.000000e+00 : f32
    %9 = vector.broadcast %cst_6 : f32 to vector<16x128xf32>
    %10 = arith.maximumf %8, %9 : vector<16x128xf32>
    %c0_7 = arith.constant 0 : index
    %c0_8 = arith.constant 0 : index
    %11 = vector.load %arg8[%c0_7, %c0_8] : memref<16x128xf32, #tpu.memory_space<vmem>>, vector<16x128xf32>
    %12 = arith.truncf %10 : vector<16x128xf32> to vector<16x128xbf16>
    %c0_9 = arith.constant 0 : index
    %c0_10 = arith.constant 0 : index
    %13 = vector.load %arg5[%c0_9, %c0_10] : memref<128x128xbf16, #tpu.memory_space<vmem>>, vector<128x128xbf16>
    %cst_11 = arith.constant dense<0.000000e+00> : vector<16x128xf32>
    %14 = tpu.matmul %12, %13, %cst_11 {dimension_numbers = #tpu.dot_dimension_numbers<[1], [0], [0], [1], [0, 0, 1, 1], [], []>} : vector<16x128xbf16>, vector<128x128xbf16>, vector<16x128xf32> -> vector<16x128xf32>
    %15 = arith.addf %11, %14 : vector<16x128xf32>
    %c0_12 = arith.constant 0 : index
    %c0_13 = arith.constant 0 : index
    %16 = vector.load %arg8[%c0_12, %c0_13] : memref<16x128xf32, #tpu.memory_space<vmem>>, vector<16x128xf32>
    tpu.vector_store %arg8[%c0_12, %c0_13], %15 {strides = array<i32>} : memref<16x128xf32, #tpu.memory_space<vmem>>, vector<16x128xf32>,
    %c0_i32_14 = arith.constant 0 : i32
    %17 = arith.cmpi eq, %arg1, %c0_i32_14 : i32
    %18 = arith.extui %17 : i1 to i32
    %c0_i32_15 = arith.constant 0 : i32
    %19 = arith.cmpi ne, %18, %c0_i32_15 : i32
    scf.if %19 {
      %c0_16 = arith.constant 0 : index
      %c0_17 = arith.constant 0 : index
      %20 = vector.load %arg8[%c0_16, %c0_17] : memref<16x128xf32, #tpu.memory_space<vmem>>, vector<16x128xf32>
      %c0_18 = arith.constant 0 : index
      %c0_19 = arith.constant 0 : index
      %21 = vector.load %arg6[%c0_18, %c0_19] : memref<1x128xf32, #tpu.memory_space<vmem>>, vector<1x128xf32>
      %22 = vector.broadcast %21 : vector<1x128xf32> to vector<16x128xf32>
      %23 = arith.addf %20, %22 : vector<16x128xf32>
      %c0_20 = arith.constant 0 : index
      %c0_21 = arith.constant 0 : index
      %24 = vector.load %arg7[%c0_20, %c0_21] : memref<16x128xf32, #tpu.memory_space<vmem>>, vector<16x128xf32>
      tpu.vector_store %arg7[%c0_20, %c0_21], %23 {strides = array<i32>} : memref<16x128xf32, #tpu.memory_space<vmem>>, vector<16x128xf32>,
    } else {
    }
    return
  }
  func.func @transform_0(%arg0: i32, %arg1: i32) -> (i32, i32) {
    %c0_i32 = arith.constant 0 : i32
    %c0_i32_0 = arith.constant 0 : i32
    return %arg0, %c0_i32 : i32, i32
  }
  func.func @transform_1(%arg0: i32, %arg1: i32) -> (i32, i32) {
    %c0_i32 = arith.constant 0 : i32
    %c0_i32_0 = arith.constant 0 : i32
    return %c0_i32, %arg1 : i32, i32
  }
  func.func @transform_2(%arg0: i32, %arg1: i32) -> (i32, i32) {
    %c0_i32 = arith.constant 0 : i32
    %c0_i32_0 = arith.constant 0 : i32
    return %c0_i32, %arg1 : i32, i32
  }
  func.func @transform_3(%arg0: i32, %arg1: i32) -> (i32, i32) {
    %c0_i32 = arith.constant 0 : i32
    %c0_i32_0 = arith.constant 0 : i32
    return %arg1, %c0_i32 : i32, i32
  }
  func.func @transform_4(%arg0: i32, %arg1: i32) -> (i32, i32) {
    %c0_i32 = arith.constant 0 : i32
    %c0_i32_0 = arith.constant 0 : i32
    %c0_i32_1 = arith.constant 0 : i32
    return %c0_i32, %c0_i32_0 : i32, i32
  }
  func.func @transform_5(%arg0: i32, %arg1: i32) -> (i32, i32) {
    %c0_i32 = arith.constant 0 : i32
    %c0_i32_0 = arith.constant 0 : i32
    return %arg0, %c0_i32 : i32, i32
  }
}

module attributes {stable_mosaic.version = 11 : i64} {
  func.func @_residual_layernorm_kernel(%arg0: i32, %arg1: memref<16x32xf32, #tpu.memory_space<vmem>>, %arg2: memref<16x32xf32, #tpu.memory_space<vmem>>, %arg3: memref<1x32xf32, #tpu.memory_space<vmem>>, %arg4: memref<1x32xf32, #tpu.memory_space<vmem>>, %arg5: memref<16x32xf32, #tpu.memory_space<vmem>>) attributes {dimension_semantics = [#tpu.dimension_semantics<parallel>], iteration_bounds = array<i64: 1>, scalar_prefetch = 0 : i64, scratch_operands = 0 : i64, tpu.core_type = #tpu.core_type<tc>, window_params = [{transform_indices = @transform_0, window_bounds = array<i64: 16, 32>}, {transform_indices = @transform_1, window_bounds = array<i64: 16, 32>}, {pipeline_mode = #tpu.pipeline_mode<synchronous>, transform_indices = @transform_2, window_bounds = array<i64: 1, 32>}, {pipeline_mode = #tpu.pipeline_mode<synchronous>, transform_indices = @transform_3, window_bounds = array<i64: 1, 32>}, {transform_indices = @transform_4, window_bounds = array<i64: 16, 32>}]} {
    %c0 = arith.constant 0 : index
    %c0_0 = arith.constant 0 : index
    %0 = vector.load %arg2[%c0, %c0_0] : memref<16x32xf32, #tpu.memory_space<vmem>>, vector<16x32xf32>
    %cst = arith.constant dense<0.000000e+00> : vector<16xf32>
    %1 = vector.multi_reduction <add>, %0, %cst [1] : vector<16x32xf32> to vector<16xf32>
    %2 = vector.shape_cast %1 : vector<16xf32> to vector<16x1xf32>
    %cst_1 = arith.constant 3.200000e+01 : f32
    %3 = vector.broadcast %cst_1 : f32 to vector<16x1xf32>
    %4 = arith.divf %2, %3 : vector<16x1xf32>
    %5 = vector.broadcast %4 : vector<16x1xf32> to vector<16x32xf32>
    %6 = arith.subf %0, %5 : vector<16x32xf32>
    %7 = arith.mulf %6, %6 : vector<16x32xf32>
    %cst_2 = arith.constant dense<0.000000e+00> : vector<16xf32>
    %8 = vector.multi_reduction <add>, %7, %cst_2 [1] : vector<16x32xf32> to vector<16xf32>
    %9 = vector.shape_cast %8 : vector<16xf32> to vector<16x1xf32>
    %cst_3 = arith.constant 3.100000e+01 : f32
    %10 = vector.broadcast %cst_3 : f32 to vector<16x1xf32>
    %11 = arith.divf %9, %10 : vector<16x1xf32>
    %12 = math.sqrt %11 : vector<16x1xf32>
    %c0_4 = arith.constant 0 : index
    %c0_5 = arith.constant 0 : index
    %13 = vector.load %arg3[%c0_4, %c0_5] : memref<1x32xf32, #tpu.memory_space<vmem>>, vector<1x32xf32>
    %14 = vector.broadcast %13 : vector<1x32xf32> to vector<16x32xf32>
    %15 = arith.mulf %14, %6 : vector<16x32xf32>
    %cst_6 = arith.constant 9.99999997E-7 : f32
    %16 = vector.broadcast %cst_6 : f32 to vector<16x1xf32>
    %17 = arith.addf %12, %16 : vector<16x1xf32>
    %18 = vector.broadcast %17 : vector<16x1xf32> to vector<16x32xf32>
    %19 = arith.divf %15, %18 : vector<16x32xf32>
    %c0_7 = arith.constant 0 : index
    %c0_8 = arith.constant 0 : index
    %20 = vector.load %arg4[%c0_7, %c0_8] : memref<1x32xf32, #tpu.memory_space<vmem>>, vector<1x32xf32>
    %21 = vector.broadcast %20 : vector<1x32xf32> to vector<16x32xf32>
    %22 = arith.addf %19, %21 : vector<16x32xf32>
    %c0_9 = arith.constant 0 : index
    %c0_10 = arith.constant 0 : index
    %23 = vector.load %arg1[%c0_9, %c0_10] : memref<16x32xf32, #tpu.memory_space<vmem>>, vector<16x32xf32>
    %24 = arith.addf %23, %22 : vector<16x32xf32>
    %c0_11 = arith.constant 0 : index
    %c0_12 = arith.constant 0 : index
    %25 = vector.load %arg5[%c0_11, %c0_12] : memref<16x32xf32, #tpu.memory_space<vmem>>, vector<16x32xf32>
    tpu.vector_store %arg5[%c0_11, %c0_12], %24 {strides = array<i32>} : memref<16x32xf32, #tpu.memory_space<vmem>>, vector<16x32xf32>,
    return
  }
  func.func @transform_0(%arg0: i32) -> (i32, i32) {
    %c0_i32 = arith.constant 0 : i32
    %c0_i32_0 = arith.constant 0 : i32
    return %arg0, %c0_i32 : i32, i32
  }
  func.func @transform_1(%arg0: i32) -> (i32, i32) {
    %c0_i32 = arith.constant 0 : i32
    %c0_i32_0 = arith.constant 0 : i32
    return %arg0, %c0_i32 : i32, i32
  }
  func.func @transform_2(%arg0: i32) -> (i32, i32) {
    %c0_i32 = arith.constant 0 : i32
    %c0_i32_0 = arith.constant 0 : i32
    %c0_i32_1 = arith.constant 0 : i32
    return %c0_i32, %c0_i32_0 : i32, i32
  }
  func.func @transform_3(%arg0: i32) -> (i32, i32) {
    %c0_i32 = arith.constant 0 : i32
    %c0_i32_0 = arith.constant 0 : i32
    %c0_i32_1 = arith.constant 0 : i32
    return %c0_i32, %c0_i32_0 : i32, i32
  }
  func.func @transform_4(%arg0: i32) -> (i32, i32) {
    %c0_i32 = arith.constant 0 : i32
    %c0_i32_0 = arith.constant 0 : i32
    return %arg0, %c0_i32 : i32, i32
  }
}

</mosaic_0001>

<bundles_post_ra>
// kernel: decoder_layer.16
= control target key start
LH: loop header
LB: loop body
LE: loop exit
PB: predicated region body
PF: predicated region fallthrough
CT: control target
= control target key end

     0   :  { %v191_v0 = vmov 0.0   ;;  %vm192_vm0 = vmmov 0   ;;  %s249_s1 = inlined_call_operand.vmem [shape: bf16[128,128], index: 1, kind: input, shape index: {}]   ;;  %s250_s0 = inlined_call_operand.vmem [shape: bf16[16,128], index: 0, kind: input, shape index: {}]   ;;  %s251_s2 = inlined_call_operand.vmem [shape: f32[1,128], index: 2, kind: input, shape index: {}]   ;;  %s252_s3 = inlined_call_operand.vmem [shape: f32[16,128], index: 3, kind: output, shape index: {}]  }
   0x1   :  { %160 = vmatprep.subr.bf16.mxu0 %v191_v0  ;;  %v182_v1 = vld [vmem:[%s249_s1 + $0x38] sm:$0xff]   ;;  %176 = vmatprep.mubr.msk.bf16.mxu0 %vm192_vm0, %v191_v0  ;;  %v183_v2 = vld [vmem:[%s249_s1 + $0x30] sm:$0xff]   ;;  %v184_v3 = vld [vmem:[%s249_s1 + $0x28] sm:$0xff]  }
   0x2   :  { %161 = vmatpush3.bf16.msra.mxu0 %v182_v1  ;;  %v185_v4 = vld [vmem:[%s249_s1 + $0x20] sm:$0xff]   ;;  %v186_v5 = vld [vmem:[%s249_s1 + $0x18] sm:$0xff]   ;;  %v187_v6 = vld [vmem:[%s249_s1 + $0x10] sm:$0xff]  }
   0x3   :  { %162 = vmatprep.subr.bf16.mxu0 %v191_v0  ;;  %v188_v7 = vld [vmem:[%s249_s1 + $0x8] sm:$0xff]   ;;  %v189_v8 = vld [vmem:[%s249_s1] sm:$0xff]  }
   0x4   :  { %v190_v9 = vld [vmem:[%s250_s0] sm:$0xff]  }
   0x5   :  { %v141_v10 = vld [vmem:[%s251_s2] ss:$0 sm:$0xff] }
   0x6   :  { %163 = vmatpush3.bf16.msra.mxu0 %v183_v2 }
   0x7   :  { %164 = vmatprep.subr.bf16.mxu0 %v191_v0 }
   0xa   :  { %165 = vmatpush3.bf16.msra.mxu0 %v184_v3 }
   0xb   :  { %166 = vmatprep.subr.bf16.mxu0 %v191_v0 }
   0xe   :  { %167 = vmatpush3.bf16.msra.mxu0 %v185_v4 }
   0xf   :  { %168 = vmatprep.subr.bf16.mxu0 %v191_v0 }
  0x12   :  { %169 = vmatpush3.bf16.msra.mxu0 %v186_v5 }
  0x13   :  { %170 = vmatprep.subr.bf16.mxu0 %v191_v0 }
  0x16   :  { %171 = vmatpush3.bf16.msra.mxu0 %v187_v6 }
  0x17   :  { %172 = vmatprep.subr.bf16.mxu0 %v191_v0 }
  0x1a   :  { %173 = vmatpush3.bf16.msra.mxu0 %v188_v7 }
  0x1b   :  { %174 = vmatprep.subr.bf16.mxu0 %v191_v0 }
  0x1e   :  { %175 = vmatpush3.bf16.msra.mxu0 %v189_v8 }
  0x21   :  { %177 = vmatmul.mubr.bf16.vlgmr.msra.gmra.mxu0 %v190_v9 }
  0xe1   :  { %v128_v11 = vpop.f32.mrf.mxu0 }
  0xe2   :  { %v129_v12 = vadd.f32 %v141_v10, %v128_v11 }
  0xe3   :  { %v178_v13 = vpop.f32.mrf.mxu0 }
  0xe4   :  { %135 = vst [vmem:[%s252_s3] sm:$0xff] %v129_v12 }
  0xe5   :  { %v131_v14 = vpop.f32.mrf.mxu0 }
  0xe6   :  { %v132_v15 = vadd.f32 %v141_v10, %v131_v14 }
  0xe7   :  { %v179_v16 = vpop.f32.mrf.mxu0 }
  0xe8   :  { %136 = vst [vmem:[%s252_s3 + $0x8] sm:$0xff] %v132_v15 }

// kernel: decoder_layer.19
= control target key start
LH: loop header
LB: loop body
LE: loop exit
PB: predicated region body
PF: predicated region fallthrough
CT: control target
= control target key end

     0   :  { %vm19_vm0 = vcmask 261120   ;;  %s155_s1 = inlined_call_operand.vmem [shape: f32[16,32], index: 1, kind: input, shape index: {}]   ;;  %s156_s2 = inlined_call_operand.vmem [shape: f32[1,32], index: 2, kind: input, shape index: {}]   ;;  %s157_s3 = inlined_call_operand.vmem [shape: f32[1,32], index: 3, kind: input, shape index: {}]   ;;  %s158_s0 = inlined_call_operand.vmem [shape: f32[16,32], index: 0, kind: input, shape index: {}]   ;;  %s159_s4 = inlined_call_operand.vmem [shape: f32[16,32], index: 4, kind: output, shape index: {}]  }
   0x1   :  { %v17_v0 = vld [vmem:[%s155_s1] sm:$0xff]  ;;  %v18_v1 = vld [vmem:[%s155_s1 + $0x8] sm:$0xff] }
   0x2   :  { %v20_v2 = vsel %vm19_vm0, %v17_v0, 0.0  ;;  %v23_v3 = vsel %vm19_vm0, %v18_v1, 0.0  ;;  %v90_v30 = vld [vmem:[%s156_s2] ss:$0 sm:$0xff]  ;;  %v81_v41 = vld [vmem:[%s158_s0 + $0x8] sm:$0xff] }
   0x3   :  { %21 = vadd.xlane.f32.xlu0 %v20_v2  ;;  %v91_v33 = vld [vmem:[%s157_s3] ss:$0 sm:$0xff] }
   0x4   :  { %v80_v35 = vld [vmem:[%s158_s0] sm:$0xff] }
   0x7   :  { %24 = vadd.xlane.f32.xlu0 %v23_v3 }
  0x8c   :  { %v22_v4 = vpop.xlane.xlu0 %21 }
  0x8d   :  { %v27_v5 = vmul.f32 0.03125, %v22_v4 }
  0x8f   :  { %v29_v6 = vsub.f32 %v17_v0, %v27_v5 }
  0x90   :  { %v25_v7 = vpop.xlane.xlu0 %24 }
  0x91   :  { %v28_v8 = vmul.f32 0.03125, %v25_v7  ;;  %v31_v9 = vmul.f32 %v29_v6, %v29_v6  ;;  %v63_v31 = vmul.f32 %v90_v30, %v29_v6 }
  0x93   :  { %v30_v10 = vsub.f32 %v18_v1, %v28_v8  ;;  %v33_v11 = vsel %vm19_vm0, %v31_v9, 0.0 }
  0x94   :  { %34 = vadd.xlane.f32.xlu1 %v33_v11 }
  0x95   :  { %v32_v12 = vmul.f32 %v30_v10, %v30_v10  ;;  %v64_v36 = vmul.f32 %v90_v30, %v30_v10 }
  0x97   :  { %v36_v13 = vsel %vm19_vm0, %v32_v12, 0.0 }
  0x98   :  { %37 = vadd.xlane.f32.xlu1 %v36_v13 }
 0x11d   :  { %v35_v14 = vpop.xlane.xlu1 %34 }
 0x11e   :  { %v40_v15 = vmul.f32 0.032258064, %v35_v14 }
 0x120   :  { %92 = vrsqrt.f32 %v40_v15  ;;  %vm44_vm1 = vcmp.eq.f32.partialorder %v40_v15, inf  ;;  %v47_v20 = vand.u32 2147483648, %v40_v15  ;;  %vm46_vm2 = vcmp.eq.f32.partialorder %v40_v15, 0.0 }
 0x121   :  { %v38_v16 = vpop.xlane.xlu1 %37 }
 0x122   :  { %v41_v17 = vmul.f32 0.032258064, %v38_v16 }
 0x124   :  { %94 = vrsqrt.f32 %v41_v17  ;;  %vm51_vm3 = vcmp.eq.f32.partialorder %v41_v17, inf  ;;  %v54_v26 = vand.u32 2147483648, %v41_v17  ;;  %vm53_vm4 = vcmp.eq.f32.partialorder %v41_v17, 0.0 }
 0x12d   :  { %v93_v18 = vpop.eup %92 }
 0x12e   :  { %v43_v19 = vmul.f32 %v93_v18, %v40_v15 }
 0x130   :  { %v45_v21 = vsel %vm44_vm1, %v40_v15, %v43_v19 }
 0x131   :  { %v95_v22 = vpop.eup %94  ;;  %v48_v23 = vsel %vm46_vm2, %v47_v20, %v45_v21 }
 0x132   :  { %v65_v24 = vadd.f32 1e-06, %v48_v23  ;;  %v50_v25 = vmul.f32 %v95_v22, %v41_v17 }
 0x134   :  { %96 = vrcp.f32 %v65_v24  ;;  %v52_v27 = vsel %vm51_vm3, %v41_v17, %v50_v25 }
 0x135   :  { %v55_v28 = vsel %vm53_vm4, %v54_v26, %v52_v27 }
 0x136   :  { %v66_v29 = vadd.f32 1e-06, %v55_v28 }
 0x138   :  { %98 = vrcp.f32 %v66_v29 }
 0x141   :  { %v97_v32 = vpop.eup %96 }
 0x142   :  { %v68_v34 = vmul.f32 %v97_v32, %v63_v31 }
 0x144   :  { %v78_v37 = vadd.f32 %v91_v33, %v68_v34 }
 0x145   :  { %v99_v38 = vpop.eup %98 }
 0x146   :  { %v82_v39 = vadd.f32 %v80_v35, %v78_v37  ;;  %v70_v40 = vmul.f32 %v99_v38, %v64_v36 }
 0x148   :  { %84 = vst.msk [vmem:[%s159_s4] sm:$0xff] %vm19_vm0, %v82_v39  ;;  %v79_v42 = vadd.f32 %v91_v33, %v70_v40 }
 0x14a   :  { %v83_v43 = vadd.f32 %v81_v41, %v79_v42 }
 0x14c   :  { %85 = vst.msk [vmem:[%s159_s4 + $0x8] sm:$0xff] %vm19_vm0, %v83_v43 }

// kernel: decoder_layer.17
= control target key start
LH: loop header
LB: loop body
LE: loop exit
PB: predicated region body
PF: predicated region fallthrough
CT: control target
= control target key end

     0   :  { %s461_s12 = smov 0   ;;  %s496_s0 = inlined_call_operand.vmem [shape: bf16[8,8,128], index: 0, kind: input, shape index: {}]   ;;  %s497_s1 = inlined_call_operand.vmem [shape: bf16[8,8,128], index: 1, kind: input, shape index: {}]   ;;  %s498_s2 = inlined_call_operand.vmem [shape: bf16[8,8,128], index: 2, kind: input, shape index: {}]   ;;  %s499_s3 = inlined_call_operand.vmem [shape: f32[8,8,128], index: 3, kind: output, shape index: {}]  }
   0x1 LB: > { %s389_s13 = sadd.s32 4294967295, %s437_s12   ;;  %p393_p0 = scmp.ge.s32.totalorder %s437_s12, 1  ;;  %s437_s12 = sphi %s461_s12, %s13_s12  }
   0x2   : > { %p154_p1 = scmp.lt.s32.totalorder %s437_s12, 9 }
   0x4   : > { %p155_p2 = pnand %p393_p0, %p154_p1 }
   0x5   : > { %p184_p3 = scmp.lt.s32.totalorder (!%p155_p2), %s389_s13, 7 }
   0x6   : > { %158 = sbr.rel (%p155_p2) target bundleno = 731 (0x2db), region = 32 }
   0xb   : > { %v439_v0 = vmov 0.0   ;;  %vm440_vm0 = vmmov 0   ;;  %s501_s13 = smov (!%p184_p3, %s389_s13), 7  ;;  %v245_v3 = vlaneseq  ;;  %vm251_vm2 = vcmask 64512  }
   0xc   : > { %405 = vmatprep.subr.bf16.mxu0 %v439_v0  ;;  %407 = vmatprep.mubr.msk.bf16.mxu0 %vm440_vm0, %v439_v0  ;;  %s472_s14 = sshll.u32 %s501_s13, 2  ;;  %vm267_vm3 = vcmask 1043456   ;;  %s397_s24 = sshll.u32 %s501_s13, 3 }
   0xd   : > { %411 = vmatprep.subr.bf16.mxu1 %v439_v0  ;;  %413 = vmatprep.mubr.msk.bf16.mxu1 %vm440_vm0, %v439_v0  ;;  %s191_s17 = scalar_lea.vmem %s497_s1, %s472_s14  ;;  %s187_s20 = scalar_lea.vmem %s496_s0, %s472_s14  ;;  %v246_v4 = vshrl.u32 %v245_v3, 7  ;;  %v248_v5 = vand.u32 127, %v245_v3 }
   0xe   : > { %v202_v1 = vld [vmem:[%s191_s17] sm:$0xf]  ;;  %s195_s23 = scalar_lea.vmem %s498_s2, %s472_s14  ;;  %s199_s27 = scalar_lea.vmem %s499_s3, %s397_s24 }
   0xf   : > { %406 = vmatpush3.bf16.xpose.msra.mxu0 %v202_v1  ;;  %v201_v2 = vld [vmem:[%s187_s20] sm:$0xf]  ;;  %vm249_vm1 = vcmp.le.s32.totalorder %v248_v5, %v246_v4 }
  0x10   : > { %v203_v18 = vld [vmem:[%s195_s23] sm:$0xf] }
  0x11   : > { %v269_v19 = vsel %vm267_vm3, %v203_v18, 0 }
  0x12   : > { %412 = vmatpush3.bf16.msra.mxu1 %v269_v19 }
  0x16   : > { %408 = vmatmul.mubr.bf16.vlgmr.msra.gmra.mxu0 %v201_v2 }
  0xd6   : > { %v238_v6 = vpop.f32.mrf.mxu0 }
  0xd7   : > { %v244_v7 = vmul.f32 0.17677669, %v238_v6 }
  0xd8   : > { %v409_v8 = vpop.f32.mrf.mxu0 }
  0xd9   : > { %v250_v9 = vsel %vm249_vm1, %v244_v7, -1e+30 }
  0xda   : > { %v241_v10 = vpop.f32.mrf.mxu0  ;;  %v252_v11 = vsel %vm251_vm2, %v250_v9, -inf }
  0xdb   : > { %253 = vmax.xlane.f32.xlu0 %v252_v11 }
  0xdc   : > { %v410_v12 = vpop.f32.mrf.mxu0 }
 0x164   : > { %v254_v13 = vpop.xlane.xlu0 %253 }
 0x165   : > { %v255_v14 = vsub.f32 %v250_v9, %v254_v13 }
 0x167   : > { %v256_v15 = vmul.f32 1.442695, %v255_v14 }
 0x169   : > { %427 = vpow2.f32 %v256_v15 }
 0x176   : > { %v428_v16 = vpop.eup %427 }
 0x177   : > { %v258_v17 = vsel %vm251_vm2, %v428_v16, 0.0 }
 0x178   : > { %259 = vadd.xlane.f32.xlu0 %v258_v17 }
 0x201   : > { %v260_v20 = vpop.xlane.xlu0 %259 }
 0x202   : > { %429 = vrcp.f32 %v260_v20 }
 0x20f   : > { %v430_v21 = vpop.eup %429 }
 0x210   : > { %v262_v22 = vmul.f32 %v430_v21, %v428_v16 }
 0x212   : > { %v263_v23 = vpack.c.bf16 %v262_v22, %v262_v22 }
 0x214   : > { %414 = vmatmul.mubr.msk.bf16.vlgmr.msra.gmra.mxu1 %vm251_vm2, %v263_v23 }
 0x2d4   : > { %v305_v24 = vpop.f32.mrf.mxu1 }
 0x2d5   : > { %311 = vst [vmem:[%s199_s27] sm:$0xff] %v305_v24 }
 0x2d6   : > { %v415_v25 = vpop.f32.mrf.mxu1 }
 0x2d8   : > { %v308_v26 = vpop.f32.mrf.mxu1 }
 0x2da   : > { %v416_v27 = vpop.f32.mrf.mxu1 }
 0x2db PF: > { %s13_s12 = sadd.s32 1, %s437_s12  }
 0x2dc   : > { %p10_p4 = scmp.ge.s32.totalorder %s13_s12, 10  }
 0x2de   :  { %12 = sbr.rel (!%p10_p4) target bundleno = 1 (0x1), region = 68 }

// kernel: decoder_layer.23
= control target key start
LH: loop header
LB: loop body
LE: loop exit
PB: predicated region body
PF: predicated region fallthrough
CT: control target
= control target key end

     0   :  { %s455_s12 = smov 0   ;;  %s485_s0 = inlined_call_operand.vmem [shape: bf16[8,8,128], index: 0, kind: input, shape index: {}]   ;;  %s486_s1 = inlined_call_operand.vmem [shape: bf16[8,8,128], index: 1, kind: input, shape index: {}]   ;;  %s487_s2 = inlined_call_operand.vmem [shape: bf16[8,8,128], index: 2, kind: input, shape index: {}]   ;;  %s488_s3 = inlined_call_operand.vmem [shape: f32[8,8,128], index: 3, kind: output, shape index: {}]  }
   0x1 LB: > { %s383_s13 = sadd.s32 4294967295, %s431_s12   ;;  %p387_p0 = scmp.ge.s32.totalorder %s431_s12, 1  ;;  %s431_s12 = sphi %s455_s12, %s13_s12  }
   0x2   : > { %p154_p1 = scmp.lt.s32.totalorder %s431_s12, 9 }
   0x4   : > { %p155_p2 = pnand %p387_p0, %p154_p1 }
   0x5   : > { %p184_p3 = scmp.lt.s32.totalorder (!%p155_p2), %s383_s13, 7 }
   0x6   : > { %158 = sbr.rel (%p155_p2) target bundleno = 730 (0x2da), region = 32 }
   0xb   : > { %v433_v0 = vmov 0.0   ;;  %vm434_vm0 = vmmov 0   ;;  %s490_s13 = smov (!%p184_p3, %s383_s13), 7  ;;  %vm245_vm1 = vcmask 64512   ;;  %vm261_vm2 = vcmask 1043456  }
   0xc   : > { %399 = vmatprep.subr.bf16.mxu0 %v433_v0  ;;  %401 = vmatprep.mubr.msk.bf16.mxu0 %vm434_vm0, %v433_v0  ;;  %s388_s14 = sshll.u32 %s490_s13, 2  ;;  %s391_s24 = sshll.u32 %s490_s13, 3 }
   0xd   : > { %405 = vmatprep.subr.bf16.mxu1 %v433_v0  ;;  %407 = vmatprep.mubr.msk.bf16.mxu1 %vm434_vm0, %v433_v0  ;;  %s191_s17 = scalar_lea.vmem %s486_s1, %s388_s14  ;;  %s187_s20 = scalar_lea.vmem %s485_s0, %s388_s14 }
   0xe   : > { %v202_v1 = vld [vmem:[%s191_s17] sm:$0xf]  ;;  %s195_s23 = scalar_lea.vmem %s487_s2, %s388_s14  ;;  %s199_s27 = scalar_lea.vmem %s488_s3, %s391_s24 }
   0xf   : > { %400 = vmatpush3.bf16.xpose.msra.mxu0 %v202_v1  ;;  %v201_v2 = vld [vmem:[%s187_s20] sm:$0xf] }
  0x10   : > { %v203_v14 = vld [vmem:[%s195_s23] sm:$0xf] }
  0x11   : > { %v263_v15 = vsel %vm261_vm2, %v203_v14, 0 }
  0x12   : > { %406 = vmatpush3.bf16.msra.mxu1 %v263_v15 }
  0x16   : > { %402 = vmatmul.mubr.bf16.vlgmr.msra.gmra.mxu0 %v201_v2 }
  0xd6   : > { %v238_v3 = vpop.f32.mrf.mxu0 }
  0xd7   : > { %v244_v4 = vmul.f32 0.17677669, %v238_v3 }
  0xd8   : > { %v403_v5 = vpop.f32.mrf.mxu0 }
  0xd9   : > { %v246_v6 = vsel %vm245_vm1, %v244_v4, -inf }
  0xda   : > { %247 = vmax.xlane.f32.xlu0 %v246_v6  ;;  %v241_v7 = vpop.f32.mrf.mxu0 }
  0xdc   : > { %v404_v8 = vpop.f32.mrf.mxu0 }
 0x163   : > { %v248_v9 = vpop.xlane.xlu0 %247 }
 0x164   : > { %v249_v10 = vsub.f32 %v244_v4, %v248_v9 }
 0x166   : > { %v250_v11 = vmul.f32 1.442695, %v249_v10 }
 0x168   : > { %421 = vpow2.f32 %v250_v11 }
 0x175   : > { %v422_v12 = vpop.eup %421 }
 0x176   : > { %v252_v13 = vsel %vm245_vm1, %v422_v12, 0.0 }
 0x177   : > { %253 = vadd.xlane.f32.xlu0 %v252_v13 }
 0x200   : > { %v254_v16 = vpop.xlane.xlu0 %253 }
 0x201   : > { %423 = vrcp.f32 %v254_v16 }
 0x20e   : > { %v424_v17 = vpop.eup %423 }
 0x20f   : > { %v256_v18 = vmul.f32 %v424_v17, %v422_v12 }
 0x211   : > { %v257_v19 = vpack.c.bf16 %v256_v18, %v256_v18 }
 0x213   : > { %408 = vmatmul.mubr.msk.bf16.vlgmr.msra.gmra.mxu1 %vm245_vm1, %v257_v19 }
 0x2d3   : > { %v299_v20 = vpop.f32.mrf.mxu1 }
 0x2d4   : > { %305 = vst [vmem:[%s199_s27] sm:$0xff] %v299_v20 }
 0x2d5   : > { %v409_v21 = vpop.f32.mrf.mxu1 }
 0x2d7   : > { %v302_v22 = vpop.f32.mrf.mxu1 }
 0x2d9   : > { %v410_v23 = vpop.f32.mrf.mxu1 }
 0x2da PF: > { %s13_s12 = sadd.s32 1, %s431_s12  }
 0x2db   : > { %p10_p4 = scmp.ge.s32.totalorder %s13_s12, 10  }
 0x2dd   :  { %12 = sbr.rel (!%p10_p4) target bundleno = 1 (0x1), region = 68 }

// kernel: decoder_layer.26
= control target key start
LH: loop header
LB: loop body
LE: loop exit
PB: predicated region body
PF: predicated region fallthrough
CT: control target
= control target key end

     0   :  { %v377_v0 = vmov 0.0   ;;  %vm378_vm0 = vmmov 0   ;;  %s472_s1 = inlined_call_operand.vmem [shape: bf16[128,128], index: 1, kind: input, shape index: {}]   ;;  %s473_s3 = inlined_call_operand.vmem [shape: bf16[128,128], index: 3, kind: input, shape index: {}]   ;;  %s474_s0 = inlined_call_operand.vmem [shape: bf16[16,128], index: 0, kind: input, shape index: {}]   ;;  %s475_s2 = inlined_call_operand.vmem [shape: f32[1,128], index: 2, kind: input, shape index: {}]   ;;  %s476_s4 = inlined_call_operand.vmem [shape: f32[1,128], index: 4, kind: input, shape index: {}]   ;;  %s477_s5 = inlined_call_operand.vmem [shape: f32[16,128], index: 5, kind: output, shape index: {}]  }
   0x1   :  { %318 = vmatprep.subr.bf16.mxu0 %v377_v0  ;;  %v360_v1 = vld [vmem:[%s472_s1 + $0x38] sm:$0xff]   ;;  %334 = vmatprep.mubr.msk.bf16.mxu0 %vm378_vm0, %v377_v0  ;;  %v361_v2 = vld [vmem:[%s472_s1 + $0x30] sm:$0xff]   ;;  %v362_v3 = vld [vmem:[%s472_s1 + $0x28] sm:$0xff]  }
   0x2   :  { %338 = vmatprep.subr.bf16.mxu1 %v377_v0  ;;  %354 = vmatprep.mubr.msk.bf16.mxu1 %vm378_vm0, %v377_v0  ;;  %v369_v4 = vld [vmem:[%s473_s3 + $0x38] sm:$0xff]   ;;  %v363_v5 = vld [vmem:[%s472_s1 + $0x20] sm:$0xff]   ;;  %v370_v6 = vld [vmem:[%s473_s3 + $0x30] sm:$0xff]  }
   0x3   :  { %319 = vmatpush3.bf16.msra.mxu0 %v360_v1  ;;  %339 = vmatpush3.bf16.msra.mxu1 %v369_v4  ;;  %v364_v7 = vld [vmem:[%s472_s1 + $0x18] sm:$0xff]   ;;  %v371_v8 = vld [vmem:[%s473_s3 + $0x28] sm:$0xff]   ;;  %v365_v9 = vld [vmem:[%s472_s1 + $0x10] sm:$0xff]  }
   0x4   :  { %320 = vmatprep.subr.bf16.mxu0 %v377_v0  ;;  %340 = vmatprep.subr.bf16.mxu1 %v377_v0  ;;  %v372_v10 = vld [vmem:[%s473_s3 + $0x20] sm:$0xff]   ;;  %v366_v11 = vld [vmem:[%s472_s1 + $0x8] sm:$0xff]   ;;  %v373_v12 = vld [vmem:[%s473_s3 + $0x18] sm:$0xff]  }
   0x5   :  { %v367_v13 = vld [vmem:[%s472_s1] sm:$0xff]   ;;  %v374_v15 = vld [vmem:[%s473_s3 + $0x10] sm:$0xff]   ;;  %v375_v16 = vld [vmem:[%s473_s3 + $0x8] sm:$0xff]  }
   0x6   :  { %v368_v14 = vld [vmem:[%s474_s0] sm:$0xff]  }
   0x7   :  { %321 = vmatpush3.bf16.msra.mxu0 %v361_v2  ;;  %341 = vmatpush3.bf16.msra.mxu1 %v370_v6  ;;  %v376_v17 = vld [vmem:[%s473_s3] sm:$0xff]  }
   0x8   :  { %322 = vmatprep.subr.bf16.mxu0 %v377_v0  ;;  %342 = vmatprep.subr.bf16.mxu1 %v377_v0  ;;  %v281_v18 = vld [vmem:[%s475_s2] ss:$0 sm:$0xff] }
   0x9   :  { %v299_v28 = vld [vmem:[%s476_s4] ss:$0 sm:$0xff] }
   0xb   :  { %323 = vmatpush3.bf16.msra.mxu0 %v362_v3  ;;  %343 = vmatpush3.bf16.msra.mxu1 %v371_v8 }
   0xc   :  { %324 = vmatprep.subr.bf16.mxu0 %v377_v0  ;;  %344 = vmatprep.subr.bf16.mxu1 %v377_v0 }
   0xf   :  { %325 = vmatpush3.bf16.msra.mxu0 %v363_v5  ;;  %345 = vmatpush3.bf16.msra.mxu1 %v372_v10 }
  0x10   :  { %326 = vmatprep.subr.bf16.mxu0 %v377_v0  ;;  %346 = vmatprep.subr.bf16.mxu1 %v377_v0 }
  0x13   :  { %327 = vmatpush3.bf16.msra.mxu0 %v364_v7  ;;  %347 = vmatpush3.bf16.msra.mxu1 %v373_v12 }
  0x14   :  { %328 = vmatprep.subr.bf16.mxu0 %v377_v0  ;;  %348 = vmatprep.subr.bf16.mxu1 %v377_v0 }
  0x17   :  { %329 = vmatpush3.bf16.msra.mxu0 %v365_v9  ;;  %349 = vmatpush3.bf16.msra.mxu1 %v374_v15 }
  0x18   :  { %330 = vmatprep.subr.bf16.mxu0 %v377_v0  ;;  %350 = vmatprep.subr.bf16.mxu1 %v377_v0 }
  0x1b   :  { %331 = vmatpush3.bf16.msra.mxu0 %v366_v11  ;;  %351 = vmatpush3.bf16.msra.mxu1 %v375_v16 }
  0x1c   :  { %332 = vmatprep.subr.bf16.mxu0 %v377_v0  ;;  %352 = vmatprep.subr.bf16.mxu1 %v377_v0 }
  0x1f   :  { %333 = vmatpush3.bf16.msra.mxu0 %v367_v13  ;;  %353 = vmatpush3.bf16.msra.mxu1 %v376_v17 }
  0x22   :  { %335 = vmatmul.mubr.bf16.vlgmr.msra.gmra.mxu0 %v368_v14 }
  0xe2   :  { %v140_v19 = vpop.f32.mrf.mxu0 }
  0xe3   :  { %v141_v21 = vadd.f32 %v281_v18, %v140_v19 }
  0xe4   :  { %v336_v20 = vpop.f32.mrf.mxu0 }
  0xe5   :  { %v147_v25 = vmax.f32 %v141_v21, 0.0 }
  0xe6   :  { %v143_v22 = vpop.f32.mrf.mxu0 }
  0xe7   :  { %v144_v23 = vadd.f32 %v281_v18, %v143_v22 }
  0xe8   :  { %v337_v24 = vpop.f32.mrf.mxu0 }
  0xe9   :  { %v148_v26 = vmax.f32 %v144_v23, 0.0 }
  0xeb   :  { %v151_v27 = vpack.c.bf16 %v148_v26, %v147_v25 }
  0xed   :  { %355 = vmatmul.mubr.bf16.vlgmr.msra.gmra.mxu1 %v151_v27 }
 0x1ad   :  { %v250_v29 = vpop.f32.mrf.mxu1 }
 0x1ae   :  { %v273_v30 = vadd.f32 %v299_v28, %v250_v29 }
 0x1af   :  { %v356_v31 = vpop.f32.mrf.mxu1 }
 0x1b0   :  { %275 = vst [vmem:[%s477_s5] sm:$0xff] %v273_v30 }
 0x1b1   :  { %v253_v32 = vpop.f32.mrf.mxu1 }
 0x1b2   :  { %v274_v33 = vadd.f32 %v299_v28, %v253_v32 }
 0x1b3   :  { %v357_v34 = vpop.f32.mrf.mxu1 }
 0x1b4   :  { %276 = vst [vmem:[%s477_s5 + $0x8] sm:$0xff] %v274_v33 }

// kernel: decoder_layer.27
= control target key start
LH: loop header
LB: loop body
LE: loop exit
PB: predicated region body
PF: predicated region fallthrough
CT: control target
= control target key end

     0   :  { %vm20_vm0 = vcmask 261120   ;;  %s193_s0 = inlined_call_operand.vmem [shape: f32[16,32], index: 0, kind: input, shape index: {}]   ;;  %s194_s1 = inlined_call_operand.vmem [shape: f32[16,32], index: 1, kind: input, shape index: {}]   ;;  %s195_s2 = inlined_call_operand.vmem [shape: f32[1,32], index: 2, kind: input, shape index: {}]   ;;  %s196_s3 = inlined_call_operand.vmem [shape: f32[1,32], index: 3, kind: input, shape index: {}]   ;;  %s197_s4 = inlined_call_operand.hbm [shape: f32[16,32], index: 4, kind: output, shape index: {}]  }
   0x1   :  { %v18_v0 = vld [vmem:[%s194_s1] sm:$0xff]  ;;  %v19_v1 = vld [vmem:[%s194_s1 + $0x8] sm:$0xff] }
   0x2   :  { %v21_v2 = vsel %vm20_vm0, %v18_v0, 0.0 }
   0x3   :  { %9 = vsyncpa [#allocation3], 0  ;;  %22 = vadd.xlane.f32.xlu0 %v21_v2  ;;  %v24_v3 = vsel %vm20_vm0, %v19_v1, 0.0  ;;  %v103_v30 = vld [vmem:[%s195_s2] ss:$0 sm:$0xff]  ;;  %s138_s24 = smov [#allocation2]  }
   0x4   :  { %v104_v33 = vld [vmem:[%s196_s3] ss:$0 sm:$0xff]  ;;  %s92_s25 = sshll.u32 %s138_s24, 4  ;;  %v82_v41 = vld [vmem:[%s193_s0 + $0x8] sm:$0xff]  ;;  %s93_s25 = int_to_ptr.vmem [resolvable:$true] %s92_s25 }
   0x5   :  { %v81_v35 = vld [vmem:[%s193_s0] sm:$0xff]  ;;  %s116_s3 = scalar_lea.vmem %s93_s25, 256  ;;  %p121_p1 = scmp.lt.s32.totalorder %s93_s25, %s93_s25 }
   0x6   :  { %p117_p0 = scmp.ne.s32.totalorder %s93_s25, %s116_s3  ;;  %p122_p2 = scmp.lt.s32.totalorder %s116_s3, %s116_s3 }
   0x7   :  { %25 = vadd.xlane.f32.xlu0 %v24_v3 }
   0x8   :  { %p123_p3 = por %p122_p2, %p121_p1 }
   0xa   :  { %p124_p4 = pnand %p123_p3, %p117_p0 }
  0x8c   :  { %v23_v4 = vpop.xlane.xlu0 %22 }
  0x8d   :  { %v28_v5 = vmul.f32 0.03125, %v23_v4 }
  0x8f   :  { %v30_v6 = vsub.f32 %v18_v0, %v28_v5 }
  0x90   :  { %v26_v7 = vpop.xlane.xlu0 %25 }
  0x91   :  { %v29_v8 = vmul.f32 0.03125, %v26_v7  ;;  %v32_v9 = vmul.f32 %v30_v6, %v30_v6  ;;  %v64_v31 = vmul.f32 %v103_v30, %v30_v6 }
  0x93   :  { %v31_v10 = vsub.f32 %v19_v1, %v29_v8  ;;  %v34_v11 = vsel %vm20_vm0, %v32_v9, 0.0 }
  0x94   :  { %35 = vadd.xlane.f32.xlu1 %v34_v11 }
  0x95   :  { %v33_v12 = vmul.f32 %v31_v10, %v31_v10  ;;  %v65_v36 = vmul.f32 %v103_v30, %v31_v10 }
  0x97   :  { %v37_v13 = vsel %vm20_vm0, %v33_v12, 0.0 }
  0x98   :  { %38 = vadd.xlane.f32.xlu1 %v37_v13 }
 0x11d   :  { %v36_v14 = vpop.xlane.xlu1 %35 }
 0x11e   :  { %v41_v15 = vmul.f32 0.032258064, %v36_v14 }
 0x120   :  { %108 = vrsqrt.f32 %v41_v15  ;;  %vm45_vm1 = vcmp.eq.f32.partialorder %v41_v15, inf  ;;  %v48_v20 = vand.u32 2147483648, %v41_v15  ;;  %vm47_vm2 = vcmp.eq.f32.partialorder %v41_v15, 0.0 }
 0x121   :  { %v39_v16 = vpop.xlane.xlu1 %38 }
 0x122   :  { %v42_v17 = vmul.f32 0.032258064, %v39_v16 }
 0x124   :  { %110 = vrsqrt.f32 %v42_v17  ;;  %vm52_vm3 = vcmp.eq.f32.partialorder %v42_v17, inf  ;;  %v55_v26 = vand.u32 2147483648, %v42_v17  ;;  %vm54_vm4 = vcmp.eq.f32.partialorder %v42_v17, 0.0 }
 0x12d   :  { %v109_v18 = vpop.eup %108 }
 0x12e   :  { %v44_v19 = vmul.f32 %v109_v18, %v41_v15 }
 0x130   :  { %v46_v21 = vsel %vm45_vm1, %v41_v15, %v44_v19 }
 0x131   :  { %v111_v22 = vpop.eup %110  ;;  %v49_v23 = vsel %vm47_vm2, %v48_v20, %v46_v21 }
 0x132   :  { %v66_v24 = vadd.f32 1e-06, %v49_v23  ;;  %v51_v25 = vmul.f32 %v111_v22, %v42_v17 }
 0x134   :  { %112 = vrcp.f32 %v66_v24  ;;  %v53_v27 = vsel %vm52_vm3, %v42_v17, %v51_v25 }
 0x135   :  { %v56_v28 = vsel %vm54_vm4, %v55_v26, %v53_v27 }
 0x136   :  { %v67_v29 = vadd.f32 1e-06, %v56_v28 }
 0x138   :  { %114 = vrcp.f32 %v67_v29 }
 0x141   :  { %v113_v32 = vpop.eup %112 }
 0x142   :  { %v69_v34 = vmul.f32 %v113_v32, %v64_v31 }
 0x144   :  { %v79_v37 = vadd.f32 %v104_v33, %v69_v34 }
 0x145   :  { %v115_v38 = vpop.eup %114 }
 0x146   :  { %v71_v39 = vmul.f32 %v115_v38, %v65_v36  ;;  %v83_v40 = vadd.f32 %v81_v35, %v79_v37 }
 0x148   :  { %v80_v42 = vadd.f32 %v104_v33, %v71_v39  ;;  %85 = vst.msk [vmem:[#allocation2] sm:$0xff] %vm20_vm0, %v83_v40 }
 0x14a   :  { %v84_v43 = vadd.f32 %v82_v41, %v80_v42 }
 0x14c   :  { %86 = vst.msk [vmem:[#allocation2 + $0x8] sm:$0xff] %vm20_vm0, %v84_v43 }
 0x14d   :  { %127 = shalt.err (!%p124_p4)
}
 0x14e   :  { %s139_s27 = smov 128   ;;  %s140_s28 = smov 8  }
 0x14f   :  { %98 = dma.vmem_to_hbm [thread:$0]  %s93_s25, 256, %s197_s4, [#allocation3], %s139_s27, %s139_s27, %s140_s28  }
 0x150   :  { %136 = dma.done.wait [#allocation3], 256  }
 0x151   :  { %137 = vsyncadd [#allocation3], 4294967040 }
 0x152   :  { %102 = vsyncpa [#allocation3], 1 }

</bundles_post_ra>
